<compile_context>
chip_gen: v7x
topology: tpu7x:2x2x1
jax: 0.10.0
libtpu: 0.0.40
codegen_flags: <defaults>
</compile_context>

<pallas_src>
import math

import jax
import jax.numpy as jnp
from jax import lax
from jax.experimental import pallas as pl
from jax.experimental.pallas import tpu as pltpu

# ---------------------------------------------------------------------------
# Model dimensions (small, synthetic)
# ---------------------------------------------------------------------------
BATCH = 2
IN_CH = 3          # image channels
IMG = 16           # image height / width
PATCH = 8          # patch size -> 2x2 = 4 patches
WIDTH = 32         # transformer width
MLP_HIDDEN = 64    # MLP hidden dim
EMBED = 32         # output embedding dim (visual projection)
LN_EPS = 1e-5

GRID_HW = IMG // PATCH
N_PATCH = GRID_HW * GRID_HW          # 4
SEQ = N_PATCH + 1                    # 5 real tokens (class + patches)
SEQ_PAD = 8                          # rows per image, padded to a full sublane group
PATCH_IN = IN_CH * PATCH * PATCH     # 192
PATCH_IN_PAD = 256                   # 2x128 lanes (2 MXU passes on v5e, 1 on v6e/v7x)
EMBED_PAD = 128                      # lane-dense output slab width

# Row indices inside the packed (8, WIDTH) layernorm-parameter slab.
LN_PRE_G, LN_PRE_B, LN1_G, LN1_B, LN2_G, LN2_B, LN_POST_G, LN_POST_B = range(8)


# ---------------------------------------------------------------------------
# In-kernel helpers (traced inside the Pallas body)
# ---------------------------------------------------------------------------
def _ln(x, g, b):
    """LayerNorm over the last dim; all elementwise math in f32."""
    mu = jnp.mean(x, axis=-1, keepdims=True)
    var = jnp.mean(jnp.square(x - mu), axis=-1, keepdims=True)
    return (x - mu) * lax.rsqrt(var + LN_EPS) * g + b


def _mm(a, b):
    """MXU matmul: bf16 operands, f32 accumulation (astype is a no-op for the
    weights, which are pre-cast to bf16 in the wrapper)."""
    return jnp.dot(a.astype(jnp.bfloat16), b.astype(jnp.bfloat16),
                   preferred_element_type=jnp.float32)


# ---------------------------------------------------------------------------
# Fused encoder kernel: one grid step == one slab of `rows` token rows
# (all B images on 1-TC chips; one image per step on multi-TC chips).
# ---------------------------------------------------------------------------
def _encoder_kernel(
    patches_ref,    # (R, PATCH_IN_PAD) f32 im2col rows (class / pad slots zero)
    patch_w_ref,    # (PATCH_IN_PAD, D) bf16 conv1 weight (zero-padded K rows)
    tok_bias_ref,   # (R, D) f32  pos_emb (+class_emb on class rows), zero on pad rows
    mask_ref,       # (R, R) f32  additive attn mask: own-image real tokens only
    ln_ref,         # (8, D) f32  packed layernorm gains / biases
    wq_ref, wk_ref, wv_ref,     # (D, D) bf16
    bq_ref, bk_ref, bv_ref,     # (1, D) f32
    wo_ref,         # (D, D) bf16
    bo_ref,         # (1, D) f32
    w_fc_ref,       # (D, H) bf16
    b_fc_ref,       # (1, H) f32
    w_out_ref,      # (H, D) bf16
    b_out_ref,      # (1, D) f32
    vproj_ref,      # (D, EMBED_PAD) bf16 visual projection (zero-padded N cols)
    o_ref,          # (R, EMBED_PAD) f32 L2-normalized per-row features
):
    D = WIDTH
    ln = ln_ref[...]

    # --- patch-embed conv (as matmul) + class token + positional embedding ---
    tok = _mm(patches_ref[...], patch_w_ref[...]) + tok_bias_ref[...]     # (R, D)

    # --- ln_pre (its output is the residual stream, as in CLIP-ViT) ---
    tok = _ln(tok, ln[LN_PRE_G:LN_PRE_G + 1], ln[LN_PRE_B:LN_PRE_B + 1])

    # --- attention sub-block (pre-LN, single head, separate lane-aligned Q/K/V) ---
    h = _ln(tok, ln[LN1_G:LN1_G + 1], ln[LN1_B:LN1_B + 1]).astype(jnp.bfloat16)
    q = jnp.dot(h, wq_ref[...], preferred_element_type=jnp.float32) + bq_ref[...]
    k = jnp.dot(h, wk_ref[...], preferred_element_type=jnp.float32) + bk_ref[...]
    v = jnp.dot(h, wv_ref[...], preferred_element_type=jnp.float32) + bv_ref[...]
    # q @ k^T without materializing a transpose: contract the last dims directly.
    s = lax.dot_general(q.astype(jnp.bfloat16), k.astype(jnp.bfloat16),
                        dimension_numbers=(((1,), (1,)), ((), ())),
                        preferred_element_type=jnp.float32)
    s = s * (1.0 / math.sqrt(D)) + mask_ref[...]
    s = s - jnp.max(s, axis=-1, keepdims=True)
    p = jnp.exp(s)
    p = p * pl.reciprocal(jnp.sum(p, axis=-1, keepdims=True), approx=True)
    a = _mm(p, v)                                                         # (R, D)
    a = _mm(a, wo_ref[...]) + bo_ref[...]
    tok = tok + a

    # --- MLP sub-block (QuickGELU; elementwise kept in f32) ---
    h = _ln(tok, ln[LN2_G:LN2_G + 1], ln[LN2_B:LN2_B + 1])
    h = _mm(h, w_fc_ref[...]) + b_fc_ref[...]
    h = h * jax.nn.sigmoid(1.702 * h)
    h = _mm(h, w_out_ref[...]) + b_out_ref[...]
    tok = tok + h

    # --- head: ln_post, visual projection, L2 normalize ---
    # Applied to every row (free within one sublane group); the wrapper keeps
    # only the class-token row of each image.
    cls = _ln(tok, ln[LN_POST_G:LN_POST_G + 1], ln[LN_POST_B:LN_POST_B + 1])
    feat = _mm(cls, vproj_ref[...])                                       # (R, 128)
    feat = feat * lax.rsqrt(jnp.sum(feat * feat, axis=-1, keepdims=True) + 1e-12)
    o_ref[...] = feat


# ---------------------------------------------------------------------------
# Wrapper
# ---------------------------------------------------------------------------
def _const_spec(arr):
    nd = arr.ndim
    return pl.BlockSpec(arr.shape, lambda i, _nd=nd: (0,) * _nd)


def _multi_tensorcore():
    """True on chips with >1 TensorCore (v7x, megacore v4/v5p): keep one image per
    'parallel' grid step there.  v5e/v6e have 1 TC, where the grid is a serial
    loop, so the whole batch is folded into a single step instead."""
    try:
        kind = jax.devices()[0].device_kind.lower()
    except Exception:
        return False
    return any(t in kind for t in ("v7", "v4", "v5p"))


def visual_encoder_forward(x_nchw, p):
    """VisualEncoder.forward: encode_image(x), then L2-normalize along last dim."""
    B, C, H, W = x_nchw.shape
    gh, gw = H // PATCH, W // PATCH
    n = gh * gw
    D = WIDTH

    nb = 1 if _multi_tensorcore() else B     # images per grid step
    steps = B // nb
    rows = nb * SEQ_PAD                      # token rows per grid step

    # im2col patchify (pure XLA layout glue) embedded into a zero-padded token slab:
    # row 0 of each image = class-token slot, rows SEQ..SEQ_PAD-1 = padding.
    patches = (
        x_nchw.reshape(B, C, gh, PATCH, gw, PATCH)
        .transpose(0, 2, 4, 1, 3, 5)
        .reshape(B, n, C * PATCH * PATCH)
        .astype(jnp.float32)
    )
    patch_slab = jnp.zeros((B, SEQ_PAD, PATCH_IN_PAD), jnp.float32)
    patch_slab = patch_slab.at[:, 1:1 + n, :PATCH_IN].set(patches)
    patch_slab = patch_slab.reshape(B * SEQ_PAD, PATCH_IN_PAD)

    # pos_emb with class_emb folded into the class row; zero on pad rows; tiled per step.
    tok_bias = jnp.zeros((SEQ_PAD, D), jnp.float32)
    tok_bias = tok_bias.at[:SEQ, :].set(p["pos_emb"])
    tok_bias = tok_bias.at[0, :].add(p["class_emb"])
    tok_bias = jnp.tile(tok_bias, (nb, 1))                              # (rows, D)

    # additive attention mask: attend only to REAL tokens of the SAME image.
    idx = jnp.arange(rows)
    same_img = (idx[:, None] // SEQ_PAD) == (idx[None, :] // SEQ_PAD)
    real_col = (idx[None, :] % SEQ_PAD) < SEQ
    mask = jnp.where(same_img & real_col, 0.0, -1e9).astype(jnp.float32)

    # Packed f32 LN params; matmul weights pre-cast to bf16 once (half DMA bytes).
    ln = jnp.stack([p["ln_pre_g"], p["ln_pre_b"], p["ln1_g"], p["ln1_b"],
                    p["ln2_g"], p["ln2_b"], p["ln_post_g"], p["ln_post_b"]], axis=0)
    bf16 = lambda a: a.astype(jnp.bfloat16)
    row = lambda a: a.reshape(1, -1).astype(jnp.float32)
    patch_w = bf16(jnp.pad(p["patch_w"], ((0, PATCH_IN_PAD - PATCH_IN), (0, 0))))
    vproj = bf16(jnp.pad(p["visual_proj"], ((0, 0), (0, EMBED_PAD - EMBED))))

    args = [
        patch_slab, patch_w, tok_bias, mask, ln,
        bf16(p["wq"]), bf16(p["wk"]), bf16(p["wv"]),
        row(p["bq"]), row(p["bk"]), row(p["bv"]),
        bf16(p["wo"]), row(p["bo"]),
        bf16(p["w_fc"]), row(p["b_fc"]),
        bf16(p["w_out"]), row(p["b_out"]),
        vproj,
    ]

    in_specs = ([pl.BlockSpec((rows, PATCH_IN_PAD), lambda i: (i, 0))]
                + [_const_spec(a) for a in args[1:]])

    out = pl.pallas_call(
        _encoder_kernel,
        out_shape=jax.ShapeDtypeStruct((B * SEQ_PAD, EMBED_PAD), jnp.float32),
        grid=(steps,),
        in_specs=in_specs,
        out_specs=pl.BlockSpec((rows, EMBED_PAD), lambda i: (i, 0)),
        compiler_params=pltpu.CompilerParams(
            dimension_semantics=("parallel",)),   # shards images across TCs on v7x
    )(*args)

    # Keep only the class-token row of each image; drop lane padding.
    return out.reshape(B, SEQ_PAD, EMBED_PAD)[:, 0, :EMBED]


# ---------------------------------------------------------------------------
# Synthetic CLIP-style visual-extractor parameters (deterministic)
# ---------------------------------------------------------------------------
def init_params(key):
    ks = jax.random.split(key, 16)
    s = 0.02
    D, Hm, E = WIDTH, MLP_HIDDEN, EMBED
    return {
        "patch_w": s * jax.random.normal(ks[0], (PATCH_IN, D), jnp.float32),
        "class_emb": s * jax.random.normal(ks[1], (D,), jnp.float32),
        "pos_emb": s * jax.random.normal(ks[2], (SEQ, D), jnp.float32),
        "ln_pre_g": jnp.ones((D,), jnp.float32), "ln_pre_b": jnp.zeros((D,), jnp.float32),
        "ln1_g": jnp.ones((D,), jnp.float32), "ln1_b": jnp.zeros((D,), jnp.float32),
        "wq": s * jax.random.normal(ks[3], (D, D), jnp.float32), "bq": jnp.zeros((D,), jnp.float32),
        "wk": s * jax.random.normal(ks[4], (D, D), jnp.float32), "bk": jnp.zeros((D,), jnp.float32),
        "wv": s * jax.random.normal(ks[5], (D, D), jnp.float32), "bv": jnp.zeros((D,), jnp.float32),
        "wo": s * jax.random.normal(ks[6], (D, D), jnp.float32), "bo": jnp.zeros((D,), jnp.float32),
        "ln2_g": jnp.ones((D,), jnp.float32), "ln2_b": jnp.zeros((D,), jnp.float32),
        "w_fc": s * jax.random.normal(ks[7], (D, Hm), jnp.float32), "b_fc": jnp.zeros((Hm,), jnp.float32),
        "w_out": s * jax.random.normal(ks[8], (Hm, D), jnp.float32), "b_out": jnp.zeros((D,), jnp.float32),
        "ln_post_g": jnp.ones((D,), jnp.float32), "ln_post_b": jnp.zeros((D,), jnp.float32),
        "visual_proj": s * jax.random.normal(ks[9], (D, E), jnp.float32),
    }


if __name__ == "__main__":
    key = jax.random.PRNGKey(0)
    k_x, k_p = jax.random.split(key)
    x = jax.random.normal(k_x, (BATCH, IN_CH, IMG, IMG), jnp.float32)  # NCHW, like torch
    params = init_params(k_p)

    fwd = jax.jit(visual_encoder_forward)
    feats = jax.block_until_ready(fwd(x, params))

    assert feats.shape == (BATCH, EMBED), feats.shape
    # Sanity: features are unit-norm along the last dim (the VisualEncoder contract).
    norms = jnp.linalg.norm(feats, axis=-1)
    assert bool(jnp.all(jnp.abs(norms - 1.0) < 2e-3)), norms
    assert bool(jnp.all(jnp.isfinite(feats)))
    print("KERNEL_OK")
</pallas_src>

<mosaic_0001>
module attributes {stable_mosaic.version = 11 : i64} {
  func.func @_encoder_kernel(%arg0: i32, %arg1: memref<16x256xf32, #tpu.memory_space<vmem>>, %arg2: memref<256x32xbf16, #tpu.memory_space<vmem>>, %arg3: memref<16x32xf32, #tpu.memory_space<vmem>>, %arg4: memref<16x16xf32, #tpu.memory_space<vmem>>, %arg5: memref<8x32xf32, #tpu.memory_space<vmem>>, %arg6: memref<32x32xbf16, #tpu.memory_space<vmem>>, %arg7: memref<32x32xbf16, #tpu.memory_space<vmem>>, %arg8: memref<32x32xbf16, #tpu.memory_space<vmem>>, %arg9: memref<1x32xf32, #tpu.memory_space<vmem>>, %arg10: memref<1x32xf32, #tpu.memory_space<vmem>>, %arg11: memref<1x32xf32, #tpu.memory_space<vmem>>, %arg12: memref<32x32xbf16, #tpu.memory_space<vmem>>, %arg13: memref<1x32xf32, #tpu.memory_space<vmem>>, %arg14: memref<32x64xbf16, #tpu.memory_space<vmem>>, %arg15: memref<1x64xf32, #tpu.memory_space<vmem>>, %arg16: memref<64x32xbf16, #tpu.memory_space<vmem>>, %arg17: memref<1x32xf32, #tpu.memory_space<vmem>>, %arg18: memref<32x128xbf16, #tpu.memory_space<vmem>>, %arg19: memref<16x128xf32, #tpu.memory_space<vmem>>) attributes {dimension_semantics = [#tpu.dimension_semantics<parallel>], iteration_bounds = array<i64: 1>, scalar_prefetch = 0 : i64, scratch_operands = 0 : i64, tpu.core_type = #tpu.core_type<tc>, window_params = [{transform_indices = @transform_0, window_bounds = array<i64: 16, 256>}, {pipeline_mode = #tpu.pipeline_mode<synchronous>, transform_indices = @transform_1, window_bounds = array<i64: 256, 32>}, {pipeline_mode = #tpu.pipeline_mode<synchronous>, transform_indices = @transform_2, window_bounds = array<i64: 16, 32>}, {pipeline_mode = #tpu.pipeline_mode<synchronous>, transform_indices = @transform_3, window_bounds = array<i64: 16, 16>}, {pipeline_mode = #tpu.pipeline_mode<synchronous>, transform_indices = @transform_4, window_bounds = array<i64: 8, 32>}, {pipeline_mode = #tpu.pipeline_mode<synchronous>, transform_indices = @transform_5, window_bounds = array<i64: 32, 32>}, {pipeline_mode = #tpu.pipeline_mode<synchronous>, transform_indices = @transform_6, window_bounds = array<i64: 32, 32>}, {pipeline_mode = #tpu.pipeline_mode<synchronous>, transform_indices = @transform_7, window_bounds = array<i64: 32, 32>}, {pipeline_mode = #tpu.pipeline_mode<synchronous>, transform_indices = @transform_8, window_bounds = array<i64: 1, 32>}, {pipeline_mode = #tpu.pipeline_mode<synchronous>, transform_indices = @transform_9, window_bounds = array<i64: 1, 32>}, {pipeline_mode = #tpu.pipeline_mode<synchronous>, transform_indices = @transform_10, window_bounds = array<i64: 1, 32>}, {pipeline_mode = #tpu.pipeline_mode<synchronous>, transform_indices = @transform_11, window_bounds = array<i64: 32, 32>}, {pipeline_mode = #tpu.pipeline_mode<synchronous>, transform_indices = @transform_12, window_bounds = array<i64: 1, 32>}, {pipeline_mode = #tpu.pipeline_mode<synchronous>, transform_indices = @transform_13, window_bounds = array<i64: 32, 64>}, {pipeline_mode = #tpu.pipeline_mode<synchronous>, transform_indices = @transform_14, window_bounds = array<i64: 1, 64>}, {pipeline_mode = #tpu.pipeline_mode<synchronous>, transform_indices = @transform_15, window_bounds = array<i64: 64, 32>}, {pipeline_mode = #tpu.pipeline_mode<synchronous>, transform_indices = @transform_16, window_bounds = array<i64: 1, 32>}, {pipeline_mode = #tpu.pipeline_mode<synchronous>, transform_indices = @transform_17, window_bounds = array<i64: 32, 128>}, {transform_indices = @transform_18, window_bounds = array<i64: 16, 128>}]} {
    %c0 = arith.constant 0 : index
    %c0_0 = arith.constant 0 : index
    %0 = vector.load %arg5[%c0, %c0_0] : memref<8x32xf32, #tpu.memory_space<vmem>>, vector<8x32xf32>
    %c0_1 = arith.constant 0 : index
    %c0_2 = arith.constant 0 : index
    %1 = vector.load %arg1[%c0_1, %c0_2] : memref<16x256xf32, #tpu.memory_space<vmem>>, vector<16x256xf32>
    %c0_3 = arith.constant 0 : index
    %c0_4 = arith.constant 0 : index
    %2 = vector.load %arg2[%c0_3, %c0_4] : memref<256x32xbf16, #tpu.memory_space<vmem>>, vector<256x32xbf16>
    %3 = arith.truncf %1 : vector<16x256xf32> to vector<16x256xbf16>
    %cst = arith.constant dense<0.000000e+00> : vector<16x32xf32>
    %4 = tpu.matmul %3, %2, %cst {dimension_numbers = #tpu.dot_dimension_numbers<[1], [0], [0], [1], [0, 0, 1, 1], [], []>} : vector<16x256xbf16>, vector<256x32xbf16>, vector<16x32xf32> -> vector<16x32xf32>
    %c0_5 = arith.constant 0 : index
    %c0_6 = arith.constant 0 : index
    %5 = vector.load %arg3[%c0_5, %c0_6] : memref<16x32xf32, #tpu.memory_space<vmem>>, vector<16x32xf32>
    %6 = arith.addf %4, %5 : vector<16x32xf32>
    %7 = vector.extract_strided_slice %0 {offsets = [0, 0], sizes = [1, 32], strides = [1, 1]} : vector<8x32xf32> to vector<1x32xf32>
    %8 = vector.extract_strided_slice %0 {offsets = [1, 0], sizes = [1, 32], strides = [1, 1]} : vector<8x32xf32> to vector<1x32xf32>
    %cst_7 = arith.constant dense<0.000000e+00> : vector<16xf32>
    %9 = vector.multi_reduction <add>, %6, %cst_7 [1] : vector<16x32xf32> to vector<16xf32>
    %10 = vector.shape_cast %9 : vector<16xf32> to vector<16x1xf32>
    %cst_8 = arith.constant 3.200000e+01 : f32
    %11 = vector.broadcast %cst_8 : f32 to vector<16x1xf32>
    %12 = arith.divf %10, %11 : vector<16x1xf32>
    %13 = vector.broadcast %12 : vector<16x1xf32> to vector<16x32xf32>
    %14 = arith.subf %6, %13 : vector<16x32xf32>
    %15 = arith.mulf %14, %14 : vector<16x32xf32>
    %cst_9 = arith.constant dense<0.000000e+00> : vector<16xf32>
    %16 = vector.multi_reduction <add>, %15, %cst_9 [1] : vector<16x32xf32> to vector<16xf32>
    %17 = vector.shape_cast %16 : vector<16xf32> to vector<16x1xf32>
    %cst_10 = arith.constant 3.200000e+01 : f32
    %18 = vector.broadcast %cst_10 : f32 to vector<16x1xf32>
    %19 = arith.divf %17, %18 : vector<16x1xf32>
    %20 = vector.broadcast %12 : vector<16x1xf32> to vector<16x32xf32>
    %21 = arith.subf %6, %20 : vector<16x32xf32>
    %cst_11 = arith.constant 9.99999974E-6 : f32
    %22 = vector.broadcast %cst_11 : f32 to vector<16x1xf32>
    %23 = arith.addf %19, %22 : vector<16x1xf32>
    %24 = math.rsqrt %23 : vector<16x1xf32>
    %25 = vector.broadcast %24 : vector<16x1xf32> to vector<16x32xf32>
    %26 = arith.mulf %21, %25 : vector<16x32xf32>
    %27 = vector.broadcast %7 : vector<1x32xf32> to vector<16x32xf32>
    %28 = arith.mulf %26, %27 : vector<16x32xf32>
    %29 = vector.broadcast %8 : vector<1x32xf32> to vector<16x32xf32>
    %30 = arith.addf %28, %29 : vector<16x32xf32>
    %31 = vector.extract_strided_slice %0 {offsets = [2, 0], sizes = [1, 32], strides = [1, 1]} : vector<8x32xf32> to vector<1x32xf32>
    %32 = vector.extract_strided_slice %0 {offsets = [3, 0], sizes = [1, 32], strides = [1, 1]} : vector<8x32xf32> to vector<1x32xf32>
    %cst_12 = arith.constant dense<0.000000e+00> : vector<16xf32>
    %33 = vector.multi_reduction <add>, %30, %cst_12 [1] : vector<16x32xf32> to vector<16xf32>
    %34 = vector.shape_cast %33 : vector<16xf32> to vector<16x1xf32>
    %cst_13 = arith.constant 3.200000e+01 : f32
    %35 = vector.broadcast %cst_13 : f32 to vector<16x1xf32>
    %36 = arith.divf %34, %35 : vector<16x1xf32>
    %37 = vector.broadcast %36 : vector<16x1xf32> to vector<16x32xf32>
    %38 = arith.subf %30, %37 : vector<16x32xf32>
    %39 = arith.mulf %38, %38 : vector<16x32xf32>
    %cst_14 = arith.constant dense<0.000000e+00> : vector<16xf32>
    %40 = vector.multi_reduction <add>, %39, %cst_14 [1] : vector<16x32xf32> to vector<16xf32>
    %41 = vector.shape_cast %40 : vector<16xf32> to vector<16x1xf32>
    %cst_15 = arith.constant 3.200000e+01 : f32
    %42 = vector.broadcast %cst_15 : f32 to vector<16x1xf32>
    %43 = arith.divf %41, %42 : vector<16x1xf32>
    %44 = vector.broadcast %36 : vector<16x1xf32> to vector<16x32xf32>
    %45 = arith.subf %30, %44 : vector<16x32xf32>
    %cst_16 = arith.constant 9.99999974E-6 : f32
    %46 = vector.broadcast %cst_16 : f32 to vector<16x1xf32>
    %47 = arith.addf %43, %46 : vector<16x1xf32>
    %48 = math.rsqrt %47 : vector<16x1xf32>
    %49 = vector.broadcast %48 : vector<16x1xf32> to vector<16x32xf32>
    %50 = arith.mulf %45, %49 : vector<16x32xf32>
    %51 = vector.broadcast %31 : vector<1x32xf32> to vector<16x32xf32>
    %52 = arith.mulf %50, %51 : vector<16x32xf32>
    %53 = vector.broadcast %32 : vector<1x32xf32> to vector<16x32xf32>
    %54 = arith.addf %52, %53 : vector<16x32xf32>
    %55 = arith.truncf %54 : vector<16x32xf32> to vector<16x32xbf16>
    %c0_17 = arith.constant 0 : index
    %c0_18 = arith.constant 0 : index
    %56 = vector.load %arg6[%c0_17, %c0_18] : memref<32x32xbf16, #tpu.memory_space<vmem>>, vector<32x32xbf16>
    %cst_19 = arith.constant dense<0.000000e+00> : vector<16x32xf32>
    %57 = tpu.matmul %55, %56, %cst_19 {dimension_numbers = #tpu.dot_dimension_numbers<[1], [0], [0], [1], [0, 0, 1, 1], [], []>} : vector<16x32xbf16>, vector<32x32xbf16>, vector<16x32xf32> -> vector<16x32xf32>
    %c0_20 = arith.constant 0 : index
    %c0_21 = arith.constant 0 : index
    %58 = vector.load %arg9[%c0_20, %c0_21] : memref<1x32xf32, #tpu.memory_space<vmem>>, vector<1x32xf32>
    %59 = vector.broadcast %58 : vector<1x32xf32> to vector<16x32xf32>
    %60 = arith.addf %57, %59 : vector<16x32xf32>
    %c0_22 = arith.constant 0 : index
    %c0_23 = arith.constant 0 : index
    %61 = vector.load %arg7[%c0_22, %c0_23] : memref<32x32xbf16, #tpu.memory_space<vmem>>, vector<32x32xbf16>
    %cst_24 = arith.constant dense<0.000000e+00> : vector<16x32xf32>
    %62 = tpu.matmul %55, %61, %cst_24 {dimension_numbers = #tpu.dot_dimension_numbers<[1], [0], [0], [1], [0, 0, 1, 1], [], []>} : vector<16x32xbf16>, vector<32x32xbf16>, vector<16x32xf32> -> vector<16x32xf32>
    %c0_25 = arith.constant 0 : index
    %c0_26 = arith.constant 0 : index
    %63 = vector.load %arg10[%c0_25, %c0_26] : memref<1x32xf32, #tpu.memory_space<vmem>>, vector<1x32xf32>
    %64 = vector.broadcast %63 : vector<1x32xf32> to vector<16x32xf32>
    %65 = arith.addf %62, %64 : vector<16x32xf32>
    %c0_27 = arith.constant 0 : index
    %c0_28 = arith.constant 0 : index
    %66 = vector.load %arg8[%c0_27, %c0_28] : memref<32x32xbf16, #tpu.memory_space<vmem>>, vector<32x32xbf16>
    %cst_29 = arith.constant dense<0.000000e+00> : vector<16x32xf32>
    %67 = tpu.matmul %55, %66, %cst_29 {dimension_numbers = #tpu.dot_dimension_numbers<[1], [0], [0], [1], [0, 0, 1, 1], [], []>} : vector<16x32xbf16>, vector<32x32xbf16>, vector<16x32xf32> -> vector<16x32xf32>
    %c0_30 = arith.constant 0 : index
    %c0_31 = arith.constant 0 : index
    %68 = vector.load %arg11[%c0_30, %c0_31] : memref<1x32xf32, #tpu.memory_space<vmem>>, vector<1x32xf32>
    %69 = vector.broadcast %68 : vector<1x32xf32> to vector<16x32xf32>
    %70 = arith.addf %67, %69 : vector<16x32xf32>
    %71 = arith.truncf %60 : vector<16x32xf32> to vector<16x32xbf16>
    %72 = arith.truncf %65 : vector<16x32xf32> to vector<16x32xbf16>
    %cst_32 = arith.constant dense<0.000000e+00> : vector<16x16xf32>
    %73 = tpu.matmul %71, %72, %cst_32 {dimension_numbers = #tpu.dot_dimension_numbers<[1], [1], [0], [0], [0, 0, 1, 0], [], []>} : vector<16x32xbf16>, vector<16x32xbf16>, vector<16x16xf32> -> vector<16x16xf32>
    %cst_33 = arith.constant 0.176776692 : f32
    %74 = vector.broadcast %cst_33 : f32 to vector<16x16xf32>
    %75 = arith.mulf %73, %74 : vector<16x16xf32>
    %c0_34 = arith.constant 0 : index
    %c0_35 = arith.constant 0 : index
    %76 = vector.load %arg4[%c0_34, %c0_35] : memref<16x16xf32, #tpu.memory_space<vmem>>, vector<16x16xf32>
    %77 = arith.addf %75, %76 : vector<16x16xf32>
    %cst_36 = arith.constant dense<0xFF800000> : vector<16xf32>
    %78 = vector.multi_reduction <maximumf>, %77, %cst_36 [1] : vector<16x16xf32> to vector<16xf32>
    %79 = vector.shape_cast %78 : vector<16xf32> to vector<16x1xf32>
    %80 = vector.broadcast %79 : vector<16x1xf32> to vector<16x16xf32>
    %81 = arith.subf %77, %80 : vector<16x16xf32>
    %82 = math.exp %81 : vector<16x16xf32>
    %cst_37 = arith.constant dense<0.000000e+00> : vector<16xf32>
    %83 = vector.multi_reduction <add>, %82, %cst_37 [1] : vector<16x16xf32> to vector<16xf32>
    %84 = vector.shape_cast %83 : vector<16xf32> to vector<16x1xf32>
    %85 = tpu.reciprocal %84 {approx = true} : vector<16x1xf32> -> vector<16x1xf32>
    %86 = vector.broadcast %85 : vector<16x1xf32> to vector<16x16xf32>
    %87 = arith.mulf %82, %86 : vector<16x16xf32>
    %88 = arith.truncf %87 : vector<16x16xf32> to vector<16x16xbf16>
    %89 = arith.truncf %70 : vector<16x32xf32> to vector<16x32xbf16>
    %cst_38 = arith.constant dense<0.000000e+00> : vector<16x32xf32>
    %90 = tpu.matmul %88, %89, %cst_38 {dimension_numbers = #tpu.dot_dimension_numbers<[1], [0], [0], [1], [0, 0, 1, 1], [], []>} : vector<16x16xbf16>, vector<16x32xbf16>, vector<16x32xf32> -> vector<16x32xf32>
    %c0_39 = arith.constant 0 : index
    %c0_40 = arith.constant 0 : index
    %91 = vector.load %arg12[%c0_39, %c0_40] : memref<32x32xbf16, #tpu.memory_space<vmem>>, vector<32x32xbf16>
    %92 = arith.truncf %90 : vector<16x32xf32> to vector<16x32xbf16>
    %cst_41 = arith.constant dense<0.000000e+00> : vector<16x32xf32>
    %93 = tpu.matmul %92, %91, %cst_41 {dimension_numbers = #tpu.dot_dimension_numbers<[1], [0], [0], [1], [0, 0, 1, 1], [], []>} : vector<16x32xbf16>, vector<32x32xbf16>, vector<16x32xf32> -> vector<16x32xf32>
    %c0_42 = arith.constant 0 : index
    %c0_43 = arith.constant 0 : index
    %94 = vector.load %arg13[%c0_42, %c0_43] : memref<1x32xf32, #tpu.memory_space<vmem>>, vector<1x32xf32>
    %95 = vector.broadcast %94 : vector<1x32xf32> to vector<16x32xf32>
    %96 = arith.addf %93, %95 : vector<16x32xf32>
    %97 = arith.addf %30, %96 : vector<16x32xf32>
    %98 = vector.extract_strided_slice %0 {offsets = [4, 0], sizes = [1, 32], strides = [1, 1]} : vector<8x32xf32> to vector<1x32xf32>
    %99 = vector.extract_strided_slice %0 {offsets = [5, 0], sizes = [1, 32], strides = [1, 1]} : vector<8x32xf32> to vector<1x32xf32>
    %cst_44 = arith.constant dense<0.000000e+00> : vector<16xf32>
    %100 = vector.multi_reduction <add>, %97, %cst_44 [1] : vector<16x32xf32> to vector<16xf32>
    %101 = vector.shape_cast %100 : vector<16xf32> to vector<16x1xf32>
    %cst_45 = arith.constant 3.200000e+01 : f32
    %102 = vector.broadcast %cst_45 : f32 to vector<16x1xf32>
    %103 = arith.divf %101, %102 : vector<16x1xf32>
    %104 = vector.broadcast %103 : vector<16x1xf32> to vector<16x32xf32>
    %105 = arith.subf %97, %104 : vector<16x32xf32>
    %106 = arith.mulf %105, %105 : vector<16x32xf32>
    %cst_46 = arith.constant dense<0.000000e+00> : vector<16xf32>
    %107 = vector.multi_reduction <add>, %106, %cst_46 [1] : vector<16x32xf32> to vector<16xf32>
    %108 = vector.shape_cast %107 : vector<16xf32> to vector<16x1xf32>
    %cst_47 = arith.constant 3.200000e+01 : f32
    %109 = vector.broadcast %cst_47 : f32 to vector<16x1xf32>
    %110 = arith.divf %108, %109 : vector<16x1xf32>
    %111 = vector.broadcast %103 : vector<16x1xf32> to vector<16x32xf32>
    %112 = arith.subf %97, %111 : vector<16x32xf32>
    %cst_48 = arith.constant 9.99999974E-6 : f32
    %113 = vector.broadcast %cst_48 : f32 to vector<16x1xf32>
    %114 = arith.addf %110, %113 : vector<16x1xf32>
    %115 = math.rsqrt %114 : vector<16x1xf32>
    %116 = vector.broadcast %115 : vector<16x1xf32> to vector<16x32xf32>
    %117 = arith.mulf %112, %116 : vector<16x32xf32>
    %118 = vector.broadcast %98 : vector<1x32xf32> to vector<16x32xf32>
    %119 = arith.mulf %117, %118 : vector<16x32xf32>
    %120 = vector.broadcast %99 : vector<1x32xf32> to vector<16x32xf32>
    %121 = arith.addf %119, %120 : vector<16x32xf32>
    %c0_49 = arith.constant 0 : index
    %c0_50 = arith.constant 0 : index
    %122 = vector.load %arg14[%c0_49, %c0_50] : memref<32x64xbf16, #tpu.memory_space<vmem>>, vector<32x64xbf16>
    %123 = arith.truncf %121 : vector<16x32xf32> to vector<16x32xbf16>
    %cst_51 = arith.constant dense<0.000000e+00> : vector<16x64xf32>
    %124 = tpu.matmul %123, %122, %cst_51 {dimension_numbers = #tpu.dot_dimension_numbers<[1], [0], [0], [1], [0, 0, 1, 1], [], []>} : vector<16x32xbf16>, vector<32x64xbf16>, vector<16x64xf32> -> vector<16x64xf32>
    %c0_52 = arith.constant 0 : index
    %c0_53 = arith.constant 0 : index
    %125 = vector.load %arg15[%c0_52, %c0_53] : memref<1x64xf32, #tpu.memory_space<vmem>>, vector<1x64xf32>
    %126 = vector.broadcast %125 : vector<1x64xf32> to vector<16x64xf32>
    %127 = arith.addf %124, %126 : vector<16x64xf32>
    %cst_54 = arith.constant 1.702000e+00 : f32
    %128 = vector.broadcast %cst_54 : f32 to vector<16x64xf32>
    %129 = arith.mulf %128, %127 : vector<16x64xf32>
    %130 = arith.negf %129 : vector<16x64xf32>
    %131 = math.exp %130 : vector<16x64xf32>
    %cst_55 = arith.constant 1.000000e+00 : f32
    %132 = vector.broadcast %cst_55 : f32 to vector<16x64xf32>
    %133 = arith.addf %132, %131 : vector<16x64xf32>
    %134 = arith.divf %132, %133 : vector<16x64xf32>
    %135 = arith.mulf %127, %134 : vector<16x64xf32>
    %c0_56 = arith.constant 0 : index
    %c0_57 = arith.constant 0 : index
    %136 = vector.load %arg16[%c0_56, %c0_57] : memref<64x32xbf16, #tpu.memory_space<vmem>>, vector<64x32xbf16>
    %137 = arith.truncf %135 : vector<16x64xf32> to vector<16x64xbf16>
    %cst_58 = arith.constant dense<0.000000e+00> : vector<16x32xf32>
    %138 = tpu.matmul %137, %136, %cst_58 {dimension_numbers = #tpu.dot_dimension_numbers<[1], [0], [0], [1], [0, 0, 1, 1], [], []>} : vector<16x64xbf16>, vector<64x32xbf16>, vector<16x32xf32> -> vector<16x32xf32>
    %c0_59 = arith.constant 0 : index
    %c0_60 = arith.constant 0 : index
    %139 = vector.load %arg17[%c0_59, %c0_60] : memref<1x32xf32, #tpu.memory_space<vmem>>, vector<1x32xf32>
    %140 = vector.broadcast %139 : vector<1x32xf32> to vector<16x32xf32>
    %141 = arith.addf %138, %140 : vector<16x32xf32>
    %142 = arith.addf %97, %141 : vector<16x32xf32>
    %143 = vector.extract_strided_slice %0 {offsets = [6, 0], sizes = [1, 32], strides = [1, 1]} : vector<8x32xf32> to vector<1x32xf32>
    %144 = vector.extract_strided_slice %0 {offsets = [7, 0], sizes = [1, 32], strides = [1, 1]} : vector<8x32xf32> to vector<1x32xf32>
    %cst_61 = arith.constant dense<0.000000e+00> : vector<16xf32>
    %145 = vector.multi_reduction <add>, %142, %cst_61 [1] : vector<16x32xf32> to vector<16xf32>
    %146 = vector.shape_cast %145 : vector<16xf32> to vector<16x1xf32>
    %cst_62 = arith.constant 3.200000e+01 : f32
    %147 = vector.broadcast %cst_62 : f32 to vector<16x1xf32>
    %148 = arith.divf %146, %147 : vector<16x1xf32>
    %149 = vector.broadcast %148 : vector<16x1xf32> to vector<16x32xf32>
    %150 = arith.subf %142, %149 : vector<16x32xf32>
    %151 = arith.mulf %150, %150 : vector<16x32xf32>
    %cst_63 = arith.constant dense<0.000000e+00> : vector<16xf32>
    %152 = vector.multi_reduction <add>, %151, %cst_63 [1] : vector<16x32xf32> to vector<16xf32>
    %153 = vector.shape_cast %152 : vector<16xf32> to vector<16x1xf32>
    %cst_64 = arith.constant 3.200000e+01 : f32
    %154 = vector.broadcast %cst_64 : f32 to vector<16x1xf32>
    %155 = arith.divf %153, %154 : vector<16x1xf32>
    %156 = vector.broadcast %148 : vector<16x1xf32> to vector<16x32xf32>
    %157 = arith.subf %142, %156 : vector<16x32xf32>
    %cst_65 = arith.constant 9.99999974E-6 : f32
    %158 = vector.broadcast %cst_65 : f32 to vector<16x1xf32>
    %159 = arith.addf %155, %158 : vector<16x1xf32>
    %160 = math.rsqrt %159 : vector<16x1xf32>
    %161 = vector.broadcast %160 : vector<16x1xf32> to vector<16x32xf32>
    %162 = arith.mulf %157, %161 : vector<16x32xf32>
    %163 = vector.broadcast %143 : vector<1x32xf32> to vector<16x32xf32>
    %164 = arith.mulf %162, %163 : vector<16x32xf32>
    %165 = vector.broadcast %144 : vector<1x32xf32> to vector<16x32xf32>
    %166 = arith.addf %164, %165 : vector<16x32xf32>
    %c0_66 = arith.constant 0 : index
    %c0_67 = arith.constant 0 : index
    %167 = vector.load %arg18[%c0_66, %c0_67] : memref<32x128xbf16, #tpu.memory_space<vmem>>, vector<32x128xbf16>
    %168 = arith.truncf %166 : vector<16x32xf32> to vector<16x32xbf16>
    %cst_68 = arith.constant dense<0.000000e+00> : vector<16x128xf32>
    %169 = tpu.matmul %168, %167, %cst_68 {dimension_numbers = #tpu.dot_dimension_numbers<[1], [0], [0], [1], [0, 0, 1, 1], [], []>} : vector<16x32xbf16>, vector<32x128xbf16>, vector<16x128xf32> -> vector<16x128xf32>
    %170 = arith.mulf %169, %169 : vector<16x128xf32>
    %cst_69 = arith.constant dense<0.000000e+00> : vector<16xf32>
    %171 = vector.multi_reduction <add>, %170, %cst_69 [1] : vector<16x128xf32> to vector<16xf32>
    %172 = vector.shape_cast %171 : vector<16xf32> to vector<16x1xf32>
    %cst_70 = arith.constant 9.99999996E-13 : f32
    %173 = vector.broadcast %cst_70 : f32 to vector<16x1xf32>
    %174 = arith.addf %172, %173 : vector<16x1xf32>
    %175 = math.rsqrt %174 : vector<16x1xf32>
    %176 = vector.broadcast %175 : vector<16x1xf32> to vector<16x128xf32>
    %177 = arith.mulf %169, %176 : vector<16x128xf32>
    %c0_71 = arith.constant 0 : index
    %c0_72 = arith.constant 0 : index
    %178 = vector.load %arg19[%c0_71, %c0_72] : memref<16x128xf32, #tpu.memory_space<vmem>>, vector<16x128xf32>
    tpu.vector_store %arg19[%c0_71, %c0_72], %177 {strides = array<i32>} : memref<16x128xf32, #tpu.memory_space<vmem>>, vector<16x128xf32>,
    return
  }
  func.func @transform_0(%arg0: i32) -> (i32, i32) {
    %c0_i32 = arith.constant 0 : i32
    %c0_i32_0 = arith.constant 0 : i32
    return %arg0, %c0_i32 : i32, i32
  }
  func.func @transform_1(%arg0: i32) -> (i32, i32) {
    %c0_i32 = arith.constant 0 : i32
    %c0_i32_0 = arith.constant 0 : i32
    %c0_i32_1 = arith.constant 0 : i32
    return %c0_i32, %c0_i32_0 : i32, i32
  }
  func.func @transform_2(%arg0: i32) -> (i32, i32) {
    %c0_i32 = arith.constant 0 : i32
    %c0_i32_0 = arith.constant 0 : i32
    %c0_i32_1 = arith.constant 0 : i32
    return %c0_i32, %c0_i32_0 : i32, i32
  }
  func.func @transform_3(%arg0: i32) -> (i32, i32) {
    %c0_i32 = arith.constant 0 : i32
    %c0_i32_0 = arith.constant 0 : i32
    %c0_i32_1 = arith.constant 0 : i32
    return %c0_i32, %c0_i32_0 : i32, i32
  }
  func.func @transform_4(%arg0: i32) -> (i32, i32) {
    %c0_i32 = arith.constant 0 : i32
    %c0_i32_0 = arith.constant 0 : i32
    %c0_i32_1 = arith.constant 0 : i32
    return %c0_i32, %c0_i32_0 : i32, i32
  }
  func.func @transform_5(%arg0: i32) -> (i32, i32) {
    %c0_i32 = arith.constant 0 : i32
    %c0_i32_0 = arith.constant 0 : i32
    %c0_i32_1 = arith.constant 0 : i32
    return %c0_i32, %c0_i32_0 : i32, i32
  }
  func.func @transform_6(%arg0: i32) -> (i32, i32) {
    %c0_i32 = arith.constant 0 : i32
    %c0_i32_0 = arith.constant 0 : i32
    %c0_i32_1 = arith.constant 0 : i32
    return %c0_i32, %c0_i32_0 : i32, i32
  }
  func.func @transform_7(%arg0: i32) -> (i32, i32) {
    %c0_i32 = arith.constant 0 : i32
    %c0_i32_0 = arith.constant 0 : i32
    %c0_i32_1 = arith.constant 0 : i32
    return %c0_i32, %c0_i32_0 : i32, i32
  }
  func.func @transform_8(%arg0: i32) -> (i32, i32) {
    %c0_i32 = arith.constant 0 : i32
    %c0_i32_0 = arith.constant 0 : i32
    %c0_i32_1 = arith.constant 0 : i32
    return %c0_i32, %c0_i32_0 : i32, i32
  }
  func.func @transform_9(%arg0: i32) -> (i32, i32) {
    %c0_i32 = arith.constant 0 : i32
    %c0_i32_0 = arith.constant 0 : i32
    %c0_i32_1 = arith.constant 0 : i32
    return %c0_i32, %c0_i32_0 : i32, i32
  }
  func.func @transform_10(%arg0: i32) -> (i32, i32) {
    %c0_i32 = arith.constant 0 : i32
    %c0_i32_0 = arith.constant 0 : i32
    %c0_i32_1 = arith.constant 0 : i32
    return %c0_i32, %c0_i32_0 : i32, i32
  }
  func.func @transform_11(%arg0: i32) -> (i32, i32) {
    %c0_i32 = arith.constant 0 : i32
    %c0_i32_0 = arith.constant 0 : i32
    %c0_i32_1 = arith.constant 0 : i32
    return %c0_i32, %c0_i32_0 : i32, i32
  }
  func.func @transform_12(%arg0: i32) -> (i32, i32) {
    %c0_i32 = arith.constant 0 : i32
    %c0_i32_0 = arith.constant 0 : i32
    %c0_i32_1 = arith.constant 0 : i32
    return %c0_i32, %c0_i32_0 : i32, i32
  }
  func.func @transform_13(%arg0: i32) -> (i32, i32) {
    %c0_i32 = arith.constant 0 : i32
    %c0_i32_0 = arith.constant 0 : i32
    %c0_i32_1 = arith.constant 0 : i32
    return %c0_i32, %c0_i32_0 : i32, i32
  }
  func.func @transform_14(%arg0: i32) -> (i32, i32) {
    %c0_i32 = arith.constant 0 : i32
    %c0_i32_0 = arith.constant 0 : i32
    %c0_i32_1 = arith.constant 0 : i32
    return %c0_i32, %c0_i32_0 : i32, i32
  }
  func.func @transform_15(%arg0: i32) -> (i32, i32) {
    %c0_i32 = arith.constant 0 : i32
    %c0_i32_0 = arith.constant 0 : i32
    %c0_i32_1 = arith.constant 0 : i32
    return %c0_i32, %c0_i32_0 : i32, i32
  }
  func.func @transform_16(%arg0: i32) -> (i32, i32) {
    %c0_i32 = arith.constant 0 : i32
    %c0_i32_0 = arith.constant 0 : i32
    %c0_i32_1 = arith.constant 0 : i32
    return %c0_i32, %c0_i32_0 : i32, i32
  }
  func.func @transform_17(%arg0: i32) -> (i32, i32) {
    %c0_i32 = arith.constant 0 : i32
    %c0_i32_0 = arith.constant 0 : i32
    %c0_i32_1 = arith.constant 0 : i32
    return %c0_i32, %c0_i32_0 : i32, i32
  }
  func.func @transform_18(%arg0: i32) -> (i32, i32) {
    %c0_i32 = arith.constant 0 : i32
    %c0_i32_0 = arith.constant 0 : i32
    return %arg0, %c0_i32 : i32, i32
  }
}

</mosaic_0001>

<bundles_post_ra>
// kernel: visual_encoder_forward.1
= control target key start
LH: loop header
LB: loop body
LE: loop exit
PB: predicated region body
PF: predicated region fallthrough
CT: control target
= control target key end

     0   :  { %vm238_vm0 = vcmask 261120   ;;  %v266_v46 = vlaneseq  ;;  %vm1273_vm1 = vmmov 0   ;;  %vm567_vm2 = vcmask 130048   ;;  %s1621_s1 = inlined_call_operand.vmem [shape: bf16[256,32], index: 1, kind: input, shape index: {}]   ;;  %s1622_s0 = inlined_call_operand.vmem [shape: f32[16,256], index: 0, kind: input, shape index: {}]   ;;  %s1623_s2 = inlined_call_operand.vmem [shape: f32[16,32], index: 2, kind: input, shape index: {}]   ;;  %s1624_s4 = inlined_call_operand.vmem [shape: f32[8,32], index: 4, kind: input, shape index: {}]   ;;  %s1625_s5 = inlined_call_operand.vmem [shape: bf16[32,32], index: 5, kind: input, shape index: {}]   ;;  %s1626_s6 = inlined_call_operand.vmem [shape: bf16[32,32], index: 6, kind: input, shape index: {}]   ;;  %s1627_s7 = inlined_call_operand.vmem [shape: bf16[32,32], index: 7, kind: input, shape index: {}]   ;;  %s1628_s8 = inlined_call_operand.vmem [shape: f32[1,32], index: 8, kind: input, shape index: {}]   ;;  %s1629_s9 = inlined_call_operand.vmem [shape: f32[1,32], index: 9, kind: input, shape index: {}]   ;;  %s1630_s10 = inlined_call_operand.vmem [shape: f32[1,32], index: 10, kind: input, shape index: {}]   ;;  %s1631_s3 = inlined_call_operand.vmem [shape: f32[16,16], index: 3, kind: input, shape index: {}]   ;;  %s1632_s11 = inlined_call_operand.vmem [shape: bf16[32,32], index: 11, kind: input, shape index: {}]   ;;  %s1633_s12 = inlined_call_operand.vmem [shape: f32[1,32], index: 12, kind: input, shape index: {}]   ;;  %s1634_s13 = inlined_call_operand.vmem [shape: bf16[32,64], index: 13, kind: input, shape index: {}]   ;;  %s1635_s15 = inlined_call_operand.vmem [shape: bf16[64,32], index: 15, kind: input, shape index: {}]   ;;  %s1636_s14 = inlined_call_operand.vmem [shape: f32[1,64], index: 14, kind: input, shape index: {}]   ;;  %s1637_s16 = inlined_call_operand.vmem [shape: f32[1,32], index: 16, kind: input, shape index: {}]   ;;  %s1638_s17 = inlined_call_operand.vmem [shape: bf16[32,128], index: 17, kind: input, shape index: {}]   ;;  %s1639_s18 = inlined_call_operand.vmem [shape: f32[16,128], index: 18, kind: output, shape index: {}]  }
   0x1   :  { %1643 = sst [smem:[#allocation2_spill]] %s1621_s1  ;;  %v1445_v53 = vld [vmem:[%s1624_s4] sm:$0xff]  ;;  %vm868_vm3 = vcmask 523264  }
   0x2   :  { %1644 = sst [smem:[#allocation3_spill]] %s1622_s0  ;;  %s1646_s29 = sld [smem:[#allocation2_spill]]  ;;  %v1439_v50 = vshrl.u32 %v266_v46, 7 }
   0x3   :  { %1645 = sst [smem:[#allocation4_spill]] %s1623_s2  ;;  %s1647_s23 = sld [smem:[#allocation3_spill]] }
   0x4   :  { %s1648_s30 = sld [smem:[#allocation4_spill]]  ;;  %v268_v52 = vsub.s32 0, %v1439_v50  ;;  %v274_v54 = vsub.s32 1, %v1439_v50 }
   0x6   :  { %v269_v55 = vrot.slane %v1445_v53, %v268_v52  ;;  %v275_v58 = vrot.slane %v1445_v53, %v274_v54 }
   0x8   :  { %v1204_v0 = vld [vmem:[%s1646_s29 + $0x40] sm:$0xff]   ;;  %v1206_v2 = vld [vmem:[%s1646_s29 + $0x48] sm:$0xff]   ;;  %v1208_v4 = vld [vmem:[%s1646_s29 + $0x50] sm:$0xff]  }
   0x9   :  { %v1205_v1 = vld [vmem:[%s1646_s29] sm:$0xff]   ;;  %1081 = vmatprep.subr.bf16.mxu0 %v1204_v0  ;;  %v1207_v3 = vld [vmem:[%s1646_s29 + $0x8] sm:$0xff]   ;;  %v1209_v5 = vld [vmem:[%s1646_s29 + $0x10] sm:$0xff]  }
   0xa   :  { %1082 = vmatpush3.bf16.msra.mxu0 %v1205_v1  ;;  %v1210_v6 = vld [vmem:[%s1646_s29 + $0x58] sm:$0xff]   ;;  %v1212_v8 = vld [vmem:[%s1646_s29 + $0x60] sm:$0xff]   ;;  %v1214_v10 = vld [vmem:[%s1646_s29 + $0x68] sm:$0xff]  }
   0xb   :  { %1083 = vmatprep.subr.bf16.mxu0 %v1206_v2  ;;  %v1211_v7 = vld [vmem:[%s1646_s29 + $0x18] sm:$0xff]   ;;  %v1213_v9 = vld [vmem:[%s1646_s29 + $0x20] sm:$0xff]   ;;  %v62_v11 = vld [vmem:[%s1647_s23 + $0x8] sm:$0xff] }
   0xc   :  { %v64_v12 = vld [vmem:[%s1647_s23 + $0x18] sm:$0xff]  ;;  %v1215_v14 = vld [vmem:[%s1646_s29 + $0x28] sm:$0xff]   ;;  %v1216_v15 = vld [vmem:[%s1646_s29 + $0x70] sm:$0xff]  }
   0xd   :  { %v98_v13 = vpack.c.bf16 %v64_v12, %v62_v11  ;;  %v1217_v16 = vld [vmem:[%s1646_s29 + $0x30] sm:$0xff]   ;;  %v1218_v17 = vld [vmem:[%s1646_s29 + $0x78] sm:$0xff]   ;;  %v61_v19 = vld [vmem:[%s1647_s23] sm:$0xff] }
   0xe   :  { %1084 = vmatpush3.bf16.msra.mxu0 %v1207_v3  ;;  %v1219_v18 = vld [vmem:[%s1646_s29 + $0x38] sm:$0xff]   ;;  %v63_v20 = vld [vmem:[%s1647_s23 + $0x10] sm:$0xff]  ;;  %v99_v24 = vld [vmem:[%s1648_s30] sm:$0xff] }
   0xf   :  { %1085 = vmatprep.subr.bf16.mxu0 %v1208_v4  ;;  %229 = vmatprep.mubr.bf16.mxu0 %v98_v13  ;;  %v97_v21 = vpack.c.bf16 %v63_v20, %v61_v19  ;;  %v100_v28 = vld [vmem:[%s1648_s30 + $0x8] sm:$0xff]  ;;  %v1220_v13 = vld [vmem:[%s1625_s5] sm:$0xff]  }
  0x12   :  { %1086 = vmatpush3.bf16.msra.mxu0 %v1209_v5 }
  0x13   :  { %1087 = vmatprep.subr.bf16.mxu0 %v1210_v6 }
  0x16   :  { %1088 = vmatpush3.bf16.msra.mxu0 %v1211_v7 }
  0x17   :  { %1089 = vmatprep.subr.bf16.mxu0 %v1212_v8 }
  0x1a   :  { %1090 = vmatpush3.bf16.msra.mxu0 %v1213_v9 }
  0x1b   :  { %1091 = vmatprep.subr.bf16.mxu0 %v1214_v10 }
  0x1e   :  { %1092 = vmatpush3.bf16.msra.mxu0 %v1215_v14  ;;  %v1272_v14 = vmov 0.0  }
  0x1f   :  { %1093 = vmatprep.subr.bf16.mxu0 %v1216_v15  ;;  %1130 = vmatprep.subr.bf16.mxu1 %v1272_v14  ;;  %v1221_v15 = vld [vmem:[%s1625_s5 + $0x8] sm:$0xff]  }
  0x20   :  { %1131 = vmatpush3.bf16.msra.mxu1 %v1220_v13  ;;  %1134 = vmatprep.mubr.msk.bf16.mxu1 %vm1273_vm1, %v1272_v14 }
  0x21   :  { %1132 = vmatprep.subr.bf16.mxu1 %v1272_v14 }
  0x22   :  { %1094 = vmatpush3.bf16.msra.mxu0 %v1217_v16 }
  0x23   :  { %1095 = vmatprep.subr.bf16.mxu0 %v1218_v17 }
  0x24   :  { %1133 = vmatpush3.bf16.msra.mxu1 %v1221_v15 }
  0x25   :  { %1138 = vmatprep.subr.bf16.mxu1 %v1272_v14 }
  0x26   :  { %1096 = vmatpush3.bf16.msra.mxu0 %v1219_v18 }
  0x27   :  { %1160 = vmatprep.subr.bf16.mxu0 %v1272_v14 }
  0x29   :  { %230 = vmatmul.mubr.bf16.vlgmr.msra.gmra.mrb[0].mxu0 %v97_v21 }
  0x2a   :  { %1162 = vmatprep.mubr.msk.bf16.mxu0 %vm1273_vm1, %v1272_v14 }
  0xfc   :  { %v1097_v22 = vpop.f32.mrb[0].mxu0 }
  0xfd   :  { %v1098_v23 = vpop.f32.mrb[1].mxu0 }
  0xfe   :  { %v1099_v25 = vadd.f32 %v1098_v23, %v1097_v22  ;;  %v1100_v26 = vpop.f32.mrb[2].mxu0  ;;  %v306_v22 = vsub.s32 2, %v1439_v50 }
  0xff   :  { %v1101_v27 = vpop.f32.mrb[3].mxu0 }
 0x100   :  { %v1102_v29 = vadd.f32 %v1101_v27, %v1100_v26  ;;  %v232_v30 = vadd.f32 %v1099_v25, %v99_v24  ;;  %v307_v25 = vrot.slane %v1445_v53, %v306_v22  ;;  %v312_v26 = vsub.s32 3, %v1439_v50 }
 0x102   :  { %v239_v31 = vsel %vm238_vm0, %v232_v30, 0.0  ;;  %v235_v32 = vadd.f32 %v1102_v29, %v100_v28 }
 0x103   :  { %240 = vadd.xlane.f32.xlu0 %v239_v31 }
 0x104   :  { %v242_v33 = vsel %vm238_vm0, %v235_v32, 0.0 }
 0x107   :  { %243 = vadd.xlane.f32.xlu0 %v242_v33 }
 0x190   :  { %v241_v34 = vpop.xlane.xlu0 %240 }
 0x191   :  { %v246_v35 = vmul.f32 0.03125, %v241_v34  ;;  %v1222_v34 = vld [vmem:[%s1626_s6] sm:$0xff]  }
 0x193   :  { %v248_v36 = vsub.f32 %v232_v30, %v246_v35  ;;  %v313_v30 = vrot.slane %v1445_v53, %v312_v26 }
 0x194   :  { %v244_v37 = vpop.xlane.xlu0 %243 }
 0x195   :  { %v247_v38 = vmul.f32 0.03125, %v244_v37  ;;  %v250_v39 = vmul.f32 %v248_v36, %v248_v36  ;;  %v1224_v37 = vld [vmem:[%s1627_s7] sm:$0xff]  }
 0x197   :  { %v249_v40 = vsub.f32 %v235_v32, %v247_v38  ;;  %v252_v41 = vsel %vm238_vm0, %v250_v39, 0.0  ;;  %v1225_v38 = vld [vmem:[%s1627_s7 + $0x8] sm:$0xff]   ;;  %v1048_v39 = vld [vmem:[%s1628_s8] ss:$0 sm:$0xff] }
 0x198   :  { %253 = vadd.xlane.f32.xlu1 %v252_v41 }
 0x199   :  { %v251_v42 = vmul.f32 %v249_v40, %v249_v40 }
 0x19b   :  { %v255_v43 = vsel %vm238_vm0, %v251_v42, 0.0 }
 0x19c   :  { %256 = vadd.xlane.f32.xlu1 %v255_v43 }
 0x225   :  { %v254_v44 = vpop.xlane.xlu1 %253 }
 0x226   :  { %v258_v45 = vmul.f32 0.03125, %v254_v44 }
 0x228   :  { %v260_v47 = vadd.f32 1e-05, %v258_v45 }
 0x229   :  { %v257_v48 = vpop.xlane.xlu1 %256 }
 0x22a   :  { %1236 = vrsqrt.f32 %v260_v47  ;;  %v259_v49 = vmul.f32 0.03125, %v257_v48  ;;  %v1052_v47 = vld [vmem:[%s1629_s9] ss:$0 sm:$0xff] }
 0x22c   :  { %v261_v51 = vadd.f32 1e-05, %v259_v49 }
 0x22e   :  { %1238 = vrsqrt.f32 %v261_v51 }
 0x234   :  { %v1237_v56 = vpop.eup %1236 }
 0x235   :  { %v264_v57 = vmul.f32 %v1237_v56, %v248_v36  ;;  %v1223_v36 = vld [vmem:[%s1626_s6 + $0x8] sm:$0xff]  }
 0x237   :  { %v270_v59 = vmul.f32 %v269_v55, %v264_v57 }
 0x238   :  { %v1239_v60 = vpop.eup %1238 }
 0x239   :  { %v1450_v61 = vadd.f32 %v275_v58, %v270_v59  ;;  %v265_v62 = vmul.f32 %v1239_v60, %v249_v40 }
 0x23b   :  { %v278_v63 = vsel %vm238_vm0, %v1450_v61, 0.0  ;;  %v271_v0 = vmul.f32 %v269_v55, %v265_v62 }
 0x23c   :  { %279 = vadd.xlane.f32.xlu0 %v278_v63 }
 0x23d   :  { %v1454_v1 = vadd.f32 %v275_v58, %v271_v0  ;;  %v1056_v58 = vld [vmem:[%s1630_s10] ss:$0 sm:$0xff] }
 0x23f   :  { %v281_v2 = vsel %vm238_vm0, %v1454_v1, 0.0 }
 0x240   :  { %282 = vadd.xlane.f32.xlu1 %v281_v2 }
 0x2c9   :  { %v280_v3 = vpop.xlane.xlu0 %279 }
 0x2ca   :  { %v284_v4 = vmul.f32 0.03125, %v280_v3 }
 0x2cc   :  { %v286_v5 = vsub.f32 %v1450_v61, %v284_v4 }
 0x2cd   :  { %v283_v6 = vpop.xlane.xlu1 %282 }
 0x2ce   :  { %v285_v7 = vmul.f32 0.03125, %v283_v6  ;;  %v288_v8 = vmul.f32 %v286_v5, %v286_v5 }
 0x2d0   :  { %v287_v9 = vsub.f32 %v1454_v1, %v285_v7  ;;  %v290_v10 = vsel %vm238_vm0, %v288_v8, 0.0 }
 0x2d1   :  { %291 = vadd.xlane.f32.xlu0 %v290_v10 }
 0x2d2   :  { %v289_v11 = vmul.f32 %v287_v9, %v287_v9 }
 0x2d4   :  { %v293_v12 = vsel %vm238_vm0, %v289_v11, 0.0 }
 0x2d5   :  { %294 = vadd.xlane.f32.xlu1 %v293_v12 }
 0x35e   :  { %v292_v16 = vpop.xlane.xlu0 %291 }
 0x35f   :  { %v296_v17 = vmul.f32 0.03125, %v292_v16 }
 0x361   :  { %v298_v18 = vadd.f32 1e-05, %v296_v17 }
 0x362   :  { %v295_v19 = vpop.xlane.xlu1 %294 }
 0x363   :  { %1240 = vrsqrt.f32 %v298_v18  ;;  %v297_v20 = vmul.f32 0.03125, %v295_v19 }
 0x365   :  { %v299_v21 = vadd.f32 1e-05, %v297_v20 }
 0x367   :  { %1242 = vrsqrt.f32 %v299_v21 }
 0x36d   :  { %v1241_v23 = vpop.eup %1240 }
 0x36e   :  { %v302_v24 = vmul.f32 %v1241_v23, %v286_v5  ;;  %v563_v5 = vld [vmem:[%s1631_s3] sm:$0xff] }
 0x370   :  { %v308_v29 = vmul.f32 %v307_v25, %v302_v24 }
 0x371   :  { %v1243_v27 = vpop.eup %1242 }
 0x372   :  { %v303_v28 = vmul.f32 %v1243_v27, %v287_v9  ;;  %v314_v32 = vadd.f32 %v313_v30, %v308_v29  ;;  %v564_v9 = vld [vmem:[%s1631_s3 + $0x8] sm:$0xff]  ;;  %v1226_v27 = vld [vmem:[%s1632_s11] sm:$0xff]  }
 0x374   :  { %v309_v31 = vmul.f32 %v307_v25, %v303_v28 }
 0x376   :  { %v315_v33 = vadd.f32 %v313_v30, %v309_v31 }
 0x378   :  { %v316_v35 = vpack.c.bf16 %v315_v33, %v314_v32 }
 0x37a   :  { %1135 = vmatmul.mubr.msk.bf16.vlgmr.msra.gmra.mrb[0].mxu1 %vm238_vm0, %v316_v35 }
 0x37b   :  { %1139 = vmatpush3.bf16.msra.mxu1 %v1222_v34  ;;  %1142 = vmatprep.mubr.msk.bf16.mxu1 %vm1273_vm1, %v1272_v14 }
 0x37c   :  { %1140 = vmatprep.subr.bf16.mxu1 %v1272_v14 }
 0x37f   :  { %1141 = vmatpush3.bf16.msra.mxu1 %v1223_v36 }
 0x380   :  { %1146 = vmatprep.subr.bf16.mxu1 %v1272_v14 }
 0x382   :  { %1143 = vmatmul.mubr.msk.bf16.vlgmr.msra.gmra.mrb[4].mxu1 %vm238_vm0, %v316_v35 }
 0x383   :  { %1147 = vmatpush3.bf16.msra.mxu1 %v1224_v37  ;;  %1150 = vmatprep.mubr.msk.bf16.mxu1 %vm1273_vm1, %v1272_v14 }
 0x384   :  { %1148 = vmatprep.subr.bf16.mxu1 %v1272_v14 }
 0x387   :  { %1149 = vmatpush3.bf16.msra.mxu1 %v1225_v38 }
 0x388   :  { %1154 = vmatprep.subr.bf16.mxu1 %v1272_v14 }
 0x38a   :  { %1151 = vmatmul.mubr.msk.bf16.vlgmr.msra.gmra.mrb[8].mxu1 %vm238_vm0, %v316_v35  ;;  %v1227_v35 = vld [vmem:[%s1632_s11 + $0x8] sm:$0xff]  }
 0x38b   :  { %1156 = vmatprep.mubr.msk.bf16.mxu1 %vm1273_vm1, %v1272_v14 }
 0x44d   :  { %v377_v40 = vpop.f32.mrb[0].mxu1 }
 0x44e   :  { %v1136_v41 = vpop.f32.mrb[1].mxu1  ;;  %v378_v43 = vadd.f32 %v1048_v39, %v377_v40 }
 0x44f   :  { %v380_v42 = vpop.f32.mrb[2].mxu1  ;;  %v1062_v41 = vld [vmem:[%s1633_s12] ss:$0 sm:$0xff] }
 0x450   :  { %v381_v44 = vadd.f32 %v1048_v39, %v380_v42  ;;  %v1137_v45 = vpop.f32.mrb[3].mxu1 }
 0x452   :  { %v512_v46 = vpack.c.bf16 %v381_v44, %v378_v43 }
 0x455   :  { %v441_v48 = vpop.f32.mrb[4].mxu1 }
 0x456   :  { %v1144_v49 = vpop.f32.mrb[5].mxu1  ;;  %v442_v52 = vadd.f32 %v1052_v47, %v441_v48 }
 0x457   :  { %v444_v51 = vpop.f32.mrb[6].mxu1 }
 0x458   :  { %v445_v54 = vadd.f32 %v1052_v47, %v444_v51  ;;  %v1145_v55 = vpop.f32.mrb[7].mxu1 }
 0x45a   :  { %v513_v56 = vpack.c.bf16 %v445_v54, %v442_v52 }
 0x45c   :  { %v518_v57 = vsel %vm238_vm0, %v513_v56, 0 }
 0x45d   :  { %v505_v59 = vpop.f32.mrb[8].mxu1  ;;  %1155 = vmatpush3.bf16.xpose.msra.mxu1 %v518_v57 }
 0x45e   :  { %v1152_v60 = vpop.f32.mrb[9].mxu1  ;;  %1166 = vmatprep.subr.bf16.mxu1 %v1272_v14  ;;  %v506_v63 = vadd.f32 %v1056_v58, %v505_v59 }
 0x45f   :  { %v508_v62 = vpop.f32.mrb[10].mxu1 }
 0x460   :  { %v509_v0 = vadd.f32 %v1056_v58, %v508_v62  ;;  %v1153_v2 = vpop.f32.mrb[11].mxu1 }
 0x462   :  { %v591_v3 = vpack.c.bf16 %v509_v0, %v506_v63  ;;  %v1228_v63 = vld [vmem:[%s1634_s13] sm:$0xff]   ;;  %v1229_v0 = vld [vmem:[%s1634_s13 + $0x8] sm:$0xff]  }
 0x464   :  { %1157 = vmatmul.mubr.msk.bf16.vlgmr.msra.gmra.mrb[12].mxu1 %vm238_vm0, %v512_v46  ;;  %1161 = vmatpush3.bf16.msra.mxu0 %v591_v3 }
 0x465   :  { %1170 = vmatprep.mubr.msk.bf16.mxu1 %vm1273_vm1, %v1272_v14  ;;  %1174 = vmatprep.subr.bf16.mxu0 %v1272_v14 }
 0x466   :  { %1167 = vmatpush3.bf16.msra.mxu1 %v1226_v27 }
 0x467   :  { %1168 = vmatprep.subr.bf16.mxu1 %v1272_v14 }
 0x46a   :  { %1169 = vmatpush3.bf16.msra.mxu1 %v1227_v35 }
 0x46b   :  { %1182 = vmatprep.subr.bf16.mxu1 %v1272_v14 }
 0x537   :  { %v554_v4 = vpop.f32.mrb[12].mxu1 }
 0x538   :  { %v561_v6 = vmul.f32 0.17677669, %v554_v4  ;;  %v1158_v7 = vpop.f32.mrb[13].mxu1 }
 0x539   :  { %v557_v8 = vpop.f32.mrb[14].mxu1 }
 0x53a   :  { %v562_v10 = vmul.f32 0.17677669, %v557_v8  ;;  %v1159_v11 = vpop.f32.mrb[15].mxu1  ;;  %v565_v12 = vadd.f32 %v563_v5, %v561_v6  ;;  %v734_v8 = vsub.s32 4, %v1439_v50 }
 0x53c   :  { %v568_v13 = vsel %vm567_vm2, %v565_v12, -inf  ;;  %v566_v15 = vadd.f32 %v564_v9, %v562_v10  ;;  %v735_v9 = vrot.slane %v1445_v53, %v734_v8  ;;  %v740_v10 = vsub.s32 5, %v1439_v50 }
 0x53d   :  { %569 = vmax.xlane.f32.xlu0 %v568_v13 }
 0x53e   :  { %v571_v16 = vsel %vm567_vm2, %v566_v15, -inf }
 0x53f   :  { %572 = vmax.xlane.f32.xlu1 %v571_v16 }
 0x5ca   :  { %v570_v17 = vpop.xlane.xlu0 %569 }
 0x5cb   :  { %v574_v18 = vsub.f32 %v565_v12, %v570_v17  ;;  %v741_v17 = vrot.slane %v1445_v53, %v740_v10 }
 0x5cc   :  { %v573_v19 = vpop.xlane.xlu1 %572 }
 0x5cd   :  { %v576_v20 = vmul.f32 1.442695, %v574_v18  ;;  %v575_v21 = vsub.f32 %v566_v15, %v573_v19 }
 0x5cf   :  { %1244 = vpow2.f32 %v576_v20  ;;  %v578_v22 = vmul.f32 1.442695, %v575_v21 }
 0x5d1   :  { %1246 = vpow2.f32 %v578_v22  ;;  %v1230_v22 = vld [vmem:[%s1635_s15] sm:$0xff]  }
 0x5d9   :  { %v1245_v23 = vpop.eup %1244 }
 0x5da   :  { %v580_v24 = vsel %vm567_vm2, %v1245_v23, 0.0 }
 0x5db   :  { %v1247_v25 = vpop.eup %1246  ;;  %581 = vadd.xlane.f32.xlu0 %v580_v24  ;;  %v1232_v24 = vld [vmem:[%s1635_s15 + $0x10] sm:$0xff]  }
 0x5dc   :  { %v583_v26 = vsel %vm567_vm2, %v1247_v25, 0.0 }
 0x5dd   :  { %584 = vadd.xlane.f32.xlu1 %v583_v26  ;;  %v1066_v26 = vld [vmem:[%s1636_s14] ss:$0 sm:$0xff] }
 0x668   :  { %v582_v28 = vpop.xlane.xlu0 %581 }
 0x669   :  { %1248 = vrcp.f32 %v582_v28 }
 0x66a   :  { %v585_v29 = vpop.xlane.xlu1 %584 }
 0x66b   :  { %1250 = vrcp.f32 %v585_v29 }
 0x673   :  { %v1249_v30 = vpop.eup %1248 }
 0x674   :  { %v588_v32 = vmul.f32 %v1249_v30, %v1245_v23  ;;  %v1231_v23 = vld [vmem:[%s1635_s15 + $0x8] sm:$0xff]  }
 0x675   :  { %v1251_v31 = vpop.eup %1250 }
 0x676   :  { %v589_v33 = vmul.f32 %v1251_v31, %v1247_v25  ;;  %v1233_v25 = vld [vmem:[%s1635_s15 + $0x18] sm:$0xff]  }
 0x678   :  { %v590_v34 = vpack.c.bf16 %v589_v33, %v588_v32 }
 0x67a   :  { %1163 = vmatmul.mubr.msk.bf16.vlgmr.msra.gmra.mrb[4].mxu0 %vm567_vm2, %v590_v34 }
 0x67b   :  { %1178 = vmatprep.mubr.msk.bf16.mxu0 %vm1273_vm1, %v1272_v14  ;;  %1175 = vmatpush3.bf16.msra.mxu0 %v1228_v63 }
 0x67c   :  { %1176 = vmatprep.subr.bf16.mxu0 %v1272_v14 }
 0x67f   :  { %1177 = vmatpush3.bf16.msra.mxu0 %v1229_v0 }
 0x680   :  { %1194 = vmatprep.subr.bf16.mxu0 %v1272_v14 }
 0x74d   :  { %v629_v36 = vpop.f32.mrb[4].mxu0 }
 0x74e   :  { %v1164_v37 = vpop.f32.mrb[5].mxu0 }
 0x74f   :  { %v632_v38 = vpop.f32.mrb[6].mxu0 }
 0x750   :  { %v640_v39 = vpack.c.bf16 %v632_v38, %v629_v36  ;;  %v1165_v40 = vpop.f32.mrb[7].mxu0 }
 0x752   :  { %1171 = vmatmul.mubr.msk.bf16.vlgmr.msra.gmra.mrb[16].mxu1 %vm238_vm0, %v640_v39 }
 0x753   :  { %1190 = vmatprep.mubr.msk.bf16.mxu1 %vm1273_vm1, %v1272_v14  ;;  %1183 = vmatpush3.bf16.msra.mxu1 %v1230_v22 }
 0x754   :  { %1184 = vmatprep.subr.bf16.mxu1 %v1272_v14 }
 0x757   :  { %1185 = vmatpush3.bf16.msra.mxu1 %v1231_v23 }
 0x758   :  { %1186 = vmatprep.subr.bf16.mxu1 %v1272_v14 }
 0x75b   :  { %1187 = vmatpush3.bf16.msra.mxu1 %v1232_v24 }
 0x75c   :  { %1188 = vmatprep.subr.bf16.mxu1 %v1272_v14 }
 0x75f   :  { %1189 = vmatpush3.bf16.msra.mxu1 %v1233_v25 }
 0x825   :  { %v697_v42 = vpop.f32.mrb[16].mxu1 }
 0x826   :  { %v698_v43 = vadd.f32 %v1062_v41, %v697_v42  ;;  %v1172_v44 = vpop.f32.mrb[17].mxu1 }
 0x827   :  { %v700_v45 = vpop.f32.mrb[18].mxu1 }
 0x828   :  { %v1548_v46 = vadd.f32 %v698_v43, %v1450_v61  ;;  %v701_v47 = vadd.f32 %v1062_v41, %v700_v45  ;;  %v1173_v48 = vpop.f32.mrb[19].mxu1 }
 0x82a   :  { %v1551_v49 = vadd.f32 %v701_v47, %v1454_v1  ;;  %v706_v51 = vsel %vm238_vm0, %v1548_v46, 0.0  ;;  %v1072_v47 = vld [vmem:[%s1637_s16] ss:$0 sm:$0xff] }
 0x82b   :  { %707 = vadd.xlane.f32.xlu0 %v706_v51 }
 0x82c   :  { %v709_v52 = vsel %vm238_vm0, %v1551_v49, 0.0 }
 0x82d   :  { %710 = vadd.xlane.f32.xlu1 %v709_v52 }
 0x8b8   :  { %v708_v54 = vpop.xlane.xlu0 %707 }
 0x8b9   :  { %v712_v55 = vmul.f32 0.03125, %v708_v54 }
 0x8ba   :  { %v711_v56 = vpop.xlane.xlu1 %710 }
 0x8bb   :  { %v714_v57 = vsub.f32 %v1548_v46, %v712_v55  ;;  %v713_v61 = vmul.f32 0.03125, %v711_v56 }
 0x8bd   :  { %v715_v58 = vsub.f32 %v1551_v49, %v713_v61  ;;  %v716_v59 = vmul.f32 %v714_v57, %v714_v57 }
 0x8bf   :  { %v718_v1 = vsel %vm238_vm0, %v716_v59, 0.0  ;;  %v717_v60 = vmul.f32 %v715_v58, %v715_v58 }
 0x8c0   :  { %719 = vadd.xlane.f32.xlu0 %v718_v1 }
 0x8c1   :  { %v721_v62 = vsel %vm238_vm0, %v717_v60, 0.0 }
 0x8c2   :  { %722 = vadd.xlane.f32.xlu1 %v721_v62 }
 0x94d   :  { %v720_v2 = vpop.xlane.xlu0 %719 }
 0x94e   :  { %v724_v3 = vmul.f32 0.03125, %v720_v2 }
 0x94f   :  { %v723_v4 = vpop.xlane.xlu1 %722 }
 0x950   :  { %v726_v5 = vadd.f32 1e-05, %v724_v3  ;;  %v725_v6 = vmul.f32 0.03125, %v723_v4 }
 0x952   :  { %1252 = vrsqrt.f32 %v726_v5  ;;  %v727_v7 = vadd.f32 1e-05, %v725_v6  ;;  %v1235_v6 = vld [vmem:[%s1638_s17 + $0x8] sm:$0xff]  }
 0x954   :  { %1254 = vrsqrt.f32 %v727_v7 }
 0x95c   :  { %v1253_v11 = vpop.eup %1252 }
 0x95d   :  { %v730_v12 = vmul.f32 %v1253_v11, %v714_v57 }
 0x95e   :  { %v1255_v13 = vpop.eup %1254 }
 0x95f   :  { %v736_v15 = vmul.f32 %v735_v9, %v730_v12  ;;  %v731_v16 = vmul.f32 %v1255_v13, %v715_v58  ;;  %v943_v13 = vsub.s32 6, %v1439_v50 }
 0x961   :  { %v737_v18 = vmul.f32 %v735_v9, %v731_v16  ;;  %v742_v19 = vadd.f32 %v741_v17, %v736_v15  ;;  %v944_v15 = vrot.slane %v1445_v53, %v943_v13  ;;  %v949_v16 = vsub.s32 7, %v1439_v50 }
 0x963   :  { %v743_v20 = vadd.f32 %v741_v17, %v737_v18 }
 0x965   :  { %v748_v21 = vpack.c.bf16 %v743_v20, %v742_v19 }
 0x967   :  { %1179 = vmatmul.mubr.msk.bf16.vlgmr.msra.gmra.mrb[8].mxu0 %vm238_vm0, %v748_v21  ;;  %v950_v21 = vrot.slane %v1445_v53, %v949_v16 }
 0x968   :  { %1198 = vmatprep.mubr.msk.bf16.mxu0 %vm1273_vm1, %v1272_v14 }
 0xa3a   :  { %v805_v27 = vpop.f32.mrb[8].mxu0 }
 0xa3b   :  { %v806_v28 = vadd.f32 %v1066_v26, %v805_v27  ;;  %v1180_v29 = vpop.f32.mrb[9].mxu0 }
 0xa3c   :  { %v808_v30 = vpop.f32.mrb[10].mxu0 }
 0xa3d   :  { %v1070_v31 = vmul.f32 -1.702, %v806_v28  ;;  %v809_v32 = vadd.f32 %v1066_v26, %v808_v30  ;;  %v1181_v33 = vpop.f32.mrb[11].mxu0 }
 0xa3f   :  { %v816_v34 = vmul.f32 1.442695, %v1070_v31  ;;  %v1071_v35 = vmul.f32 -1.702, %v809_v32 }
 0xa41   :  { %1256 = vpow2.f32 %v816_v34  ;;  %v818_v36 = vmul.f32 1.442695, %v1071_v35 }
 0xa43   :  { %1258 = vpow2.f32 %v818_v36 }
 0xa4b   :  { %v1257_v37 = vpop.eup %1256 }
 0xa4c   :  { %v820_v38 = vadd.f32 1.0, %v1257_v37 }
 0xa4d   :  { %v1259_v39 = vpop.eup %1258 }
 0xa4e   :  { %1260 = vrcp.f32 %v820_v38  ;;  %v821_v40 = vadd.f32 1.0, %v1259_v39 }
 0xa50   :  { %1262 = vrcp.f32 %v821_v40 }
 0xa58   :  { %v1261_v41 = vpop.eup %1260 }
 0xa59   :  { %v826_v43 = vmul.f32 %v1261_v41, %v806_v28 }
 0xa5a   :  { %v1263_v42 = vpop.eup %1262 }
 0xa5b   :  { %v827_v44 = vmul.f32 %v1263_v42, %v809_v32 }
 0xa5d   :  { %v836_v45 = vpack.c.bf16 %v827_v44, %v826_v43 }
 0xa5f   :  { %1191 = vmatmul.mubr.msk.bf16.vlgmr.msra.gmra.mrb[20].mxu1 %vm868_vm3, %v836_v45 }
 0xb32   :  { %v906_v48 = vpop.f32.mrb[20].mxu1 }
 0xb33   :  { %v907_v51 = vadd.f32 %v1072_v47, %v906_v48  ;;  %v1192_v52 = vpop.f32.mrb[21].mxu1 }
 0xb34   :  { %v909_v54 = vpop.f32.mrb[22].mxu1 }
 0xb35   :  { %v910_v55 = vadd.f32 %v1072_v47, %v909_v54  ;;  %v1193_v56 = vpop.f32.mrb[23].mxu1  ;;  %v913_v57 = vadd.f32 %v907_v51, %v1548_v46 }
 0xb37   :  { %v915_v61 = vsel %vm238_vm0, %v913_v57, 0.0  ;;  %v914_v58 = vadd.f32 %v910_v55, %v1551_v49  ;;  %v1234_v49 = vld [vmem:[%s1638_s17] sm:$0xff]  }
 0xb38   :  { %916 = vadd.xlane.f32.xlu0 %v915_v61  ;;  %1195 = vmatpush3.bf16.msra.mxu0 %v1234_v49 }
 0xb39   :  { %v918_v59 = vsel %vm238_vm0, %v914_v58, 0.0  ;;  %1196 = vmatprep.subr.bf16.mxu0 %v1272_v14 }
 0xb3a   :  { %919 = vadd.xlane.f32.xlu1 %v918_v59 }
 0xb3c   :  { %1197 = vmatpush3.bf16.msra.mxu0 %v1235_v6 }
 0xbc5   :  { %v917_v1 = vpop.xlane.xlu0 %916 }
 0xbc6   :  { %v921_v60 = vmul.f32 0.03125, %v917_v1 }
 0xbc7   :  { %v920_v62 = vpop.xlane.xlu1 %919 }
 0xbc8   :  { %v923_v63 = vsub.f32 %v913_v57, %v921_v60  ;;  %v922_v0 = vmul.f32 0.03125, %v920_v62 }
 0xbca   :  { %v924_v2 = vsub.f32 %v914_v58, %v922_v0  ;;  %v925_v3 = vmul.f32 %v923_v63, %v923_v63 }
 0xbcc   :  { %v927_v4 = vsel %vm238_vm0, %v925_v3, 0.0  ;;  %v926_v5 = vmul.f32 %v924_v2, %v924_v2 }
 0xbcd   :  { %928 = vadd.xlane.f32.xlu0 %v927_v4 }
 0xbce   :  { %v930_v46 = vsel %vm238_vm0, %v926_v5, 0.0 }
 0xbcf   :  { %931 = vadd.xlane.f32.xlu1 %v930_v46 }
 0xc5a   :  { %v929_v7 = vpop.xlane.xlu0 %928 }
 0xc5b   :  { %v933_v8 = vmul.f32 0.03125, %v929_v7 }
 0xc5c   :  { %v932_v9 = vpop.xlane.xlu1 %931 }
 0xc5d   :  { %v935_v10 = vadd.f32 1e-05, %v933_v8  ;;  %v934_v11 = vmul.f32 0.03125, %v932_v9 }
 0xc5f   :  { %1264 = vrsqrt.f32 %v935_v10  ;;  %v936_v12 = vadd.f32 1e-05, %v934_v11 }
 0xc61   :  { %1266 = vrsqrt.f32 %v936_v12 }
 0xc69   :  { %v1265_v14 = vpop.eup %1264 }
 0xc6a   :  { %v939_v17 = vmul.f32 %v1265_v14, %v923_v63 }
 0xc6b   :  { %v1267_v18 = vpop.eup %1266 }
 0xc6c   :  { %v945_v19 = vmul.f32 %v944_v15, %v939_v17  ;;  %v940_v20 = vmul.f32 %v1267_v18, %v924_v2 }
 0xc6e   :  { %v946_v22 = vmul.f32 %v944_v15, %v940_v20  ;;  %v951_v23 = vadd.f32 %v950_v21, %v945_v19 }
 0xc70   :  { %v952_v24 = vadd.f32 %v950_v21, %v946_v22 }
 0xc72   :  { %v957_v25 = vpack.c.bf16 %v952_v24, %v951_v23 }
 0xc74   :  { %1199 = vmatmul.mubr.msk.bf16.vlgmr.msra.gmra.mrb[12].mxu0 %vm238_vm0, %v957_v25 }
 0xd47   :  { %v1007_v26 = vpop.f32.mrb[12].mxu0 }
 0xd48   :  { %v1200_v27 = vpop.f32.mrb[13].mxu0  ;;  %v1014_v28 = vmul.f32 %v1007_v26, %v1007_v26 }
 0xd49   :  { %v1010_v29 = vpop.f32.mrb[14].mxu0 }
 0xd4a   :  { %1016 = vadd.xlane.f32.xlu0 %v1014_v28  ;;  %v1201_v30 = vpop.f32.mrb[15].mxu0  ;;  %v1015_v50 = vmul.f32 %v1010_v29, %v1010_v29 }
 0xd4c   :  { %1018 = vadd.xlane.f32.xlu1 %v1015_v50 }
 0xdd7   :  { %v1017_v31 = vpop.xlane.xlu0 %1016 }
 0xdd8   :  { %v1020_v32 = vadd.f32 1e-12, %v1017_v31 }
 0xdd9   :  { %v1019_v33 = vpop.xlane.xlu1 %1018 }
 0xdda   :  { %1268 = vrsqrt.f32 %v1020_v32  ;;  %v1021_v34 = vadd.f32 1e-12, %v1019_v33 }
 0xddc   :  { %1270 = vrsqrt.f32 %v1021_v34 }
 0xde4   :  { %v1269_v53 = vpop.eup %1268 }
 0xde5   :  { %v1024_v35 = vmul.f32 %v1269_v53, %v1007_v26 }
 0xde6   :  { %v1271_v36 = vpop.eup %1270 }
 0xde7   :  { %1026 = vst [vmem:[%s1639_s18] sm:$0xff] %v1024_v35  ;;  %v1025_v37 = vmul.f32 %v1271_v36, %v1010_v29 }
 0xde9   :  { %1027 = vst [vmem:[%s1639_s18 + $0x8] sm:$0xff] %v1025_v37 }

</bundles_post_ra>
